<compile_context>
chip_gen: v5e
topology: v5e:2x2
jax: 0.10.0
libtpu: 0.0.40
codegen_flags: <defaults>
</compile_context>

<pallas_src>
import jax
import jax.numpy as jnp
from jax.experimental import pallas as pl
from jax.experimental.pallas import tpu as pltpu


def decoder_nav_kernel(img_ref, zs_ref, w1a_ref, w1b_ref, b1_ref,
                       w2_ref, b2_ref, w3_ref, b3_ref, out_ref):
    # Cast activations to bf16 in-kernel (VPU cast; VALU has large slack).
    img_bf = img_ref[...].astype(jnp.bfloat16)                    # (tb, 128)
    zs_bf = zs_ref[...].astype(jnp.bfloat16)                      # (tb, 12)

    # Layer 1: split-K Linear(140 -> 64) + ReLU.  img branch K=128
    # (MXU-aligned), zs branch K=12.  bf16 operands, f32 accumulation.
    h1 = jnp.dot(img_bf, w1a_ref[...], preferred_element_type=jnp.float32)
    h1 = h1 + jnp.dot(zs_bf, w1b_ref[...], preferred_element_type=jnp.float32)
    h1 = jnp.maximum(h1 + b1_ref[...], 0.0)                       # (tb, 64) f32

    # Layer 2: Linear(64 -> 64) + ReLU
    h2 = jnp.dot(h1.astype(jnp.bfloat16), w2_ref[...],
                 preferred_element_type=jnp.float32)
    h2 = jnp.maximum(h2 + b2_ref[...], 0.0)                       # (tb, 64) f32

    # Layer 3: Linear(64 -> 3)
    logits = jnp.dot(h2.astype(jnp.bfloat16), w3_ref[...],
                     preferred_element_type=jnp.float32)
    logits = logits + b3_ref[...]                                 # (tb, 3) f32

    # Numerically stable softmax over dim=1 (exact divide so rows sum to 1).
    m = jnp.max(logits, axis=1, keepdims=True)
    e = jnp.exp(logits - m)
    denom = jnp.sum(e, axis=1, keepdims=True)
    probs = e / denom                                             # (tb, 3) f32

    # Lane-dense store: write (d_out, tb) instead of tb strided 12-byte rows.
    out_ref[...] = jnp.transpose(probs)                           # (3, tb)


def _choose_tb(batch, block_b):
    """Batch tile: big enough to amortize ~0.35us/step, small enough to give
    large batches >= 4 grid steps (v7x has 2 TensorCores)."""
    if batch <= 512:
        return batch                      # single block: full-dim blocks are always legal
    tb = min(block_b, max(128, ((batch + 3) // 4 // 128) * 128))
    return tb                             # multiple of 128 -> (8,128)-aligned


def decoder_nav_forward(img_feats, zs, params, *, block_b=2048):
    """img_feats: (B, dim_img_feat) f32, zs: (B, z_dim) f32 -> (B, dim_output) f32."""
    w1a, w1b = params["w1a"], params["w1b"]
    b1, w2, b2 = params["b1"], params["w2"], params["b2"]
    w3, b3 = params["w3"], params["b3"]

    B, d_img = img_feats.shape
    d_z = zs.shape[1]
    d_h = w2.shape[0]
    d_out = w3.shape[1]

    tb = _choose_tb(B, block_b)
    grid = (pl.cdiv(B, tb),)

    # Advisory cost estimate (f32 activations in, bf16 weights, f32 out).
    flops = 2 * B * (d_img * d_h + d_z * d_h + d_h * d_h + d_h * d_out)
    bytes_accessed = (
        B * (d_img + d_z) * 4                                     # f32 activations in
        + ((d_img + d_z) * d_h + d_h * d_h + d_h * d_out) * 2     # bf16 weights
        + (2 * d_h + d_out) * 4                                   # f32 biases
        + B * d_out * 4                                           # f32 output
    )
    cost = pl.CostEstimate(flops=flops,
                           transcendentals=B * d_out,
                           bytes_accessed=bytes_accessed)

    # TODO(synk): if the zs DMA (24 B/row) ever shows in profiles, store zs
    # transposed (d_z, B) in HBM and load a lane-dense (d_z, tb) block.
    out_t = pl.pallas_call(
        decoder_nav_kernel,
        out_shape=jax.ShapeDtypeStruct((d_out, B), jnp.float32),
        grid=grid,
        in_specs=[
            pl.BlockSpec((tb, d_img), lambda i: (i, 0)),     # img batch block
            pl.BlockSpec((tb, d_z), lambda i: (i, 0)),       # zs batch block
            pl.BlockSpec((d_img, d_h), lambda i: (0, 0)),    # W1a (VMEM resident)
            pl.BlockSpec((d_z, d_h), lambda i: (0, 0)),      # W1b (VMEM resident)
            pl.BlockSpec((1, d_h), lambda i: (0, 0)),        # b1
            pl.BlockSpec((d_h, d_h), lambda i: (0, 0)),      # W2
            pl.BlockSpec((1, d_h), lambda i: (0, 0)),        # b2
            pl.BlockSpec((d_h, d_out), lambda i: (0, 0)),    # W3
            pl.BlockSpec((1, d_out), lambda i: (0, 0)),      # b3
        ],
        out_specs=pl.BlockSpec((d_out, tb), lambda i: (0, i)),   # lane-dense
        compiler_params=pltpu.CompilerParams(
            dimension_semantics=("parallel",)),
        cost_estimate=cost,
    )(img_feats, zs, w1a, w1b, b1, w2, b2, w3, b3)

    # Tiny (3, B) -> (B, 3) transpose in the wrapper; negligible vs input bytes.
    return jnp.transpose(out_t)


def init_params(key, dim_img_feat=128, z_dim=12, dim_output=3):
    """Deterministic synthetic parameters (PyTorch Linear init), stored as
    (in, out) with W1 pre-split into the img / zs branches.  Weights bf16,
    biases f32."""
    d_in = dim_img_feat + z_dim
    d_h = dim_img_feat // 2
    ks = jax.random.split(key, 6)

    def lin(kw, kb, fan_in, fan_out):
        bound = 1.0 / jnp.sqrt(fan_in)
        w = jax.random.uniform(kw, (fan_in, fan_out), jnp.float32, -bound, bound)
        b = jax.random.uniform(kb, (1, fan_out), jnp.float32, -bound, bound)
        return w, b

    w1, b1 = lin(ks[0], ks[1], d_in, d_h)
    w2, b2 = lin(ks[2], ks[3], d_h, d_h)
    w3, b3 = lin(ks[4], ks[5], d_h, dim_output)
    return dict(
        w1a=w1[:dim_img_feat].astype(jnp.bfloat16),   # (128, 64)
        w1b=w1[dim_img_feat:].astype(jnp.bfloat16),   # (12, 64)
        b1=b1,
        w2=w2.astype(jnp.bfloat16), b2=b2,
        w3=w3.astype(jnp.bfloat16), b3=b3,
    )


def reference_forward(img_feats, zs, params):
    """Pure-JAX reference mirroring the kernel's bf16-operand / f32-accumulate
    matmuls (so only accumulation order differs)."""
    bf = jnp.bfloat16
    h1 = (jnp.dot(img_feats.astype(bf), params["w1a"],
                  preferred_element_type=jnp.float32)
          + jnp.dot(zs.astype(bf), params["w1b"],
                    preferred_element_type=jnp.float32)
          + params["b1"])
    h1 = jnp.maximum(h1, 0.0)
    h2 = jnp.dot(h1.astype(bf), params["w2"],
                 preferred_element_type=jnp.float32) + params["b2"]
    h2 = jnp.maximum(h2, 0.0)
    logits = jnp.dot(h2.astype(bf), params["w3"],
                     preferred_element_type=jnp.float32) + params["b3"]
    return jax.nn.softmax(logits, axis=1)


if __name__ == "__main__":
    key = jax.random.PRNGKey(0)
    k_params, k_img, k_z = jax.random.split(key, 3)

    B = 8
    dim_img_feat, z_dim, dim_output = 128, 12, 3

    params = init_params(k_params, dim_img_feat, z_dim, dim_output)
    img_feats = jax.random.normal(k_img, (B, dim_img_feat), jnp.float32)
    zs = jax.random.normal(k_z, (B, z_dim), jnp.float32)

    out = decoder_nav_forward(img_feats, zs, params)
    out = jax.block_until_ready(out)

    ref = reference_forward(img_feats, zs, params)
    assert out.shape == (B, dim_output)
    assert jnp.allclose(out, ref, atol=1e-3, rtol=1e-3), "mismatch vs reference"
    assert jnp.allclose(jnp.sum(out, axis=1), 1.0, atol=1e-3), \
        "softmax rows must sum to 1"

    print("KERNEL_OK")
</pallas_src>

<mosaic_0001>
module attributes {stable_mosaic.version = 11 : i64} {
  func.func @decoder_nav_kernel(%arg0: i32, %arg1: memref<8x128xf32, #tpu.memory_space<vmem>>, %arg2: memref<8x12xf32, #tpu.memory_space<vmem>>, %arg3: memref<128x64xbf16, #tpu.memory_space<vmem>>, %arg4: memref<12x64xbf16, #tpu.memory_space<vmem>>, %arg5: memref<1x64xf32, #tpu.memory_space<vmem>>, %arg6: memref<64x64xbf16, #tpu.memory_space<vmem>>, %arg7: memref<1x64xf32, #tpu.memory_space<vmem>>, %arg8: memref<64x3xbf16, #tpu.memory_space<vmem>>, %arg9: memref<1x3xf32, #tpu.memory_space<vmem>>, %arg10: memref<3x8xf32, #tpu.memory_space<vmem>>) attributes {dimension_semantics = [#tpu.dimension_semantics<parallel>], iteration_bounds = array<i64: 1>, scalar_prefetch = 0 : i64, scratch_operands = 0 : i64, tpu.core_type = #tpu.core_type<tc>, window_params = [{transform_indices = @transform_0, window_bounds = array<i64: 8, 128>}, {transform_indices = @transform_1, window_bounds = array<i64: 8, 12>}, {pipeline_mode = #tpu.pipeline_mode<synchronous>, transform_indices = @transform_2, window_bounds = array<i64: 128, 64>}, {pipeline_mode = #tpu.pipeline_mode<synchronous>, transform_indices = @transform_3, window_bounds = array<i64: 12, 64>}, {pipeline_mode = #tpu.pipeline_mode<synchronous>, transform_indices = @transform_4, window_bounds = array<i64: 1, 64>}, {pipeline_mode = #tpu.pipeline_mode<synchronous>, transform_indices = @transform_5, window_bounds = array<i64: 64, 64>}, {pipeline_mode = #tpu.pipeline_mode<synchronous>, transform_indices = @transform_6, window_bounds = array<i64: 1, 64>}, {pipeline_mode = #tpu.pipeline_mode<synchronous>, transform_indices = @transform_7, window_bounds = array<i64: 64, 3>}, {pipeline_mode = #tpu.pipeline_mode<synchronous>, transform_indices = @transform_8, window_bounds = array<i64: 1, 3>}, {transform_indices = @transform_9, window_bounds = array<i64: 3, 8>}]} {
    %c0 = arith.constant 0 : index
    %c0_0 = arith.constant 0 : index
    %0 = vector.load %arg1[%c0, %c0_0] : memref<8x128xf32, #tpu.memory_space<vmem>>, vector<8x128xf32>
    %1 = arith.truncf %0 : vector<8x128xf32> to vector<8x128xbf16>
    %c0_1 = arith.constant 0 : index
    %c0_2 = arith.constant 0 : index
    %2 = vector.load %arg2[%c0_1, %c0_2] : memref<8x12xf32, #tpu.memory_space<vmem>>, vector<8x12xf32>
    %3 = arith.truncf %2 : vector<8x12xf32> to vector<8x12xbf16>
    %c0_3 = arith.constant 0 : index
    %c0_4 = arith.constant 0 : index
    %4 = vector.load %arg3[%c0_3, %c0_4] : memref<128x64xbf16, #tpu.memory_space<vmem>>, vector<128x64xbf16>
    %cst = arith.constant dense<0.000000e+00> : vector<8x64xf32>
    %5 = tpu.matmul %1, %4, %cst {dimension_numbers = #tpu.dot_dimension_numbers<[1], [0], [0], [1], [0, 0, 1, 1], [], []>} : vector<8x128xbf16>, vector<128x64xbf16>, vector<8x64xf32> -> vector<8x64xf32>
    %c0_5 = arith.constant 0 : index
    %c0_6 = arith.constant 0 : index
    %6 = vector.load %arg4[%c0_5, %c0_6] : memref<12x64xbf16, #tpu.memory_space<vmem>>, vector<12x64xbf16>
    %cst_7 = arith.constant dense<0.000000e+00> : vector<8x64xf32>
    %7 = tpu.matmul %3, %6, %cst_7 {dimension_numbers = #tpu.dot_dimension_numbers<[1], [0], [0], [1], [0, 0, 1, 1], [], []>} : vector<8x12xbf16>, vector<12x64xbf16>, vector<8x64xf32> -> vector<8x64xf32>
    %8 = arith.addf %5, %7 : vector<8x64xf32>
    %c0_8 = arith.constant 0 : index
    %c0_9 = arith.constant 0 : index
    %9 = vector.load %arg5[%c0_8, %c0_9] : memref<1x64xf32, #tpu.memory_space<vmem>>, vector<1x64xf32>
    %10 = vector.broadcast %9 : vector<1x64xf32> to vector<8x64xf32>
    %11 = arith.addf %8, %10 : vector<8x64xf32>
    %cst_10 = arith.constant 0.000000e+00 : f32
    %12 = vector.broadcast %cst_10 : f32 to vector<8x64xf32>
    %13 = arith.maximumf %11, %12 : vector<8x64xf32>
    %14 = arith.truncf %13 : vector<8x64xf32> to vector<8x64xbf16>
    %c0_11 = arith.constant 0 : index
    %c0_12 = arith.constant 0 : index
    %15 = vector.load %arg6[%c0_11, %c0_12] : memref<64x64xbf16, #tpu.memory_space<vmem>>, vector<64x64xbf16>
    %cst_13 = arith.constant dense<0.000000e+00> : vector<8x64xf32>
    %16 = tpu.matmul %14, %15, %cst_13 {dimension_numbers = #tpu.dot_dimension_numbers<[1], [0], [0], [1], [0, 0, 1, 1], [], []>} : vector<8x64xbf16>, vector<64x64xbf16>, vector<8x64xf32> -> vector<8x64xf32>
    %c0_14 = arith.constant 0 : index
    %c0_15 = arith.constant 0 : index
    %17 = vector.load %arg7[%c0_14, %c0_15] : memref<1x64xf32, #tpu.memory_space<vmem>>, vector<1x64xf32>
    %18 = vector.broadcast %17 : vector<1x64xf32> to vector<8x64xf32>
    %19 = arith.addf %16, %18 : vector<8x64xf32>
    %cst_16 = arith.constant 0.000000e+00 : f32
    %20 = vector.broadcast %cst_16 : f32 to vector<8x64xf32>
    %21 = arith.maximumf %19, %20 : vector<8x64xf32>
    %22 = arith.truncf %21 : vector<8x64xf32> to vector<8x64xbf16>
    %c0_17 = arith.constant 0 : index
    %c0_18 = arith.constant 0 : index
    %23 = vector.load %arg8[%c0_17, %c0_18] : memref<64x3xbf16, #tpu.memory_space<vmem>>, vector<64x3xbf16>
    %cst_19 = arith.constant dense<0.000000e+00> : vector<8x3xf32>
    %24 = tpu.matmul %22, %23, %cst_19 {dimension_numbers = #tpu.dot_dimension_numbers<[1], [0], [0], [1], [0, 0, 1, 1], [], []>} : vector<8x64xbf16>, vector<64x3xbf16>, vector<8x3xf32> -> vector<8x3xf32>
    %c0_20 = arith.constant 0 : index
    %c0_21 = arith.constant 0 : index
    %25 = vector.load %arg9[%c0_20, %c0_21] : memref<1x3xf32, #tpu.memory_space<vmem>>, vector<1x3xf32>
    %26 = vector.broadcast %25 : vector<1x3xf32> to vector<8x3xf32>
    %27 = arith.addf %24, %26 : vector<8x3xf32>
    %cst_22 = arith.constant dense<0xFF800000> : vector<8xf32>
    %28 = vector.multi_reduction <maximumf>, %27, %cst_22 [1] : vector<8x3xf32> to vector<8xf32>
    %29 = vector.shape_cast %28 : vector<8xf32> to vector<8x1xf32>
    %30 = vector.broadcast %29 : vector<8x1xf32> to vector<8x3xf32>
    %31 = arith.subf %27, %30 : vector<8x3xf32>
    %32 = math.exp %31 : vector<8x3xf32>
    %cst_23 = arith.constant dense<0.000000e+00> : vector<8xf32>
    %33 = vector.multi_reduction <add>, %32, %cst_23 [1] : vector<8x3xf32> to vector<8xf32>
    %34 = vector.shape_cast %33 : vector<8xf32> to vector<8x1xf32>
    %35 = vector.broadcast %34 : vector<8x1xf32> to vector<8x3xf32>
    %36 = arith.divf %32, %35 : vector<8x3xf32>
    %37 = tpu.transpose %36, [1, 0] : vector<8x3xf32> -> vector<3x8xf32>
    %c0_24 = arith.constant 0 : index
    %c0_25 = arith.constant 0 : index
    %38 = vector.load %arg10[%c0_24, %c0_25] : memref<3x8xf32, #tpu.memory_space<vmem>>, vector<3x8xf32>
    tpu.vector_store %arg10[%c0_24, %c0_25], %37 {strides = array<i32>} : memref<3x8xf32, #tpu.memory_space<vmem>>, vector<3x8xf32>,
    return
  }
  func.func @transform_0(%arg0: i32) -> (i32, i32) {
    %c0_i32 = arith.constant 0 : i32
    %c0_i32_0 = arith.constant 0 : i32
    return %arg0, %c0_i32 : i32, i32
  }
  func.func @transform_1(%arg0: i32) -> (i32, i32) {
    %c0_i32 = arith.constant 0 : i32
    %c0_i32_0 = arith.constant 0 : i32
    return %arg0, %c0_i32 : i32, i32
  }
  func.func @transform_2(%arg0: i32) -> (i32, i32) {
    %c0_i32 = arith.constant 0 : i32
    %c0_i32_0 = arith.constant 0 : i32
    %c0_i32_1 = arith.constant 0 : i32
    return %c0_i32, %c0_i32_0 : i32, i32
  }
  func.func @transform_3(%arg0: i32) -> (i32, i32) {
    %c0_i32 = arith.constant 0 : i32
    %c0_i32_0 = arith.constant 0 : i32
    %c0_i32_1 = arith.constant 0 : i32
    return %c0_i32, %c0_i32_0 : i32, i32
  }
  func.func @transform_4(%arg0: i32) -> (i32, i32) {
    %c0_i32 = arith.constant 0 : i32
    %c0_i32_0 = arith.constant 0 : i32
    %c0_i32_1 = arith.constant 0 : i32
    return %c0_i32, %c0_i32_0 : i32, i32
  }
  func.func @transform_5(%arg0: i32) -> (i32, i32) {
    %c0_i32 = arith.constant 0 : i32
    %c0_i32_0 = arith.constant 0 : i32
    %c0_i32_1 = arith.constant 0 : i32
    return %c0_i32, %c0_i32_0 : i32, i32
  }
  func.func @transform_6(%arg0: i32) -> (i32, i32) {
    %c0_i32 = arith.constant 0 : i32
    %c0_i32_0 = arith.constant 0 : i32
    %c0_i32_1 = arith.constant 0 : i32
    return %c0_i32, %c0_i32_0 : i32, i32
  }
  func.func @transform_7(%arg0: i32) -> (i32, i32) {
    %c0_i32 = arith.constant 0 : i32
    %c0_i32_0 = arith.constant 0 : i32
    %c0_i32_1 = arith.constant 0 : i32
    return %c0_i32, %c0_i32_0 : i32, i32
  }
  func.func @transform_8(%arg0: i32) -> (i32, i32) {
    %c0_i32 = arith.constant 0 : i32
    %c0_i32_0 = arith.constant 0 : i32
    %c0_i32_1 = arith.constant 0 : i32
    return %c0_i32, %c0_i32_0 : i32, i32
  }
  func.func @transform_9(%arg0: i32) -> (i32, i32) {
    %c0_i32 = arith.constant 0 : i32
    %c0_i32_0 = arith.constant 0 : i32
    return %c0_i32, %arg0 : i32, i32
  }
}

</mosaic_0001>

<bundles_post_ra>
// kernel: tpu_custom_call.1
= control target key start
LH: loop header
LB: loop body
LE: loop exit
PB: predicated region body
PF: predicated region fallthrough
CT: control target
= control target key end

     0   :  { %vm65_vm0 = vcmask 1045504   ;;  %s578_s0 = inlined_call_operand.vmem [shape: f32[8,128], index: 0, kind: input, shape index: {}]   ;;  %s579_s1 = inlined_call_operand.vmem [shape: f32[8,12], index: 1, kind: input, shape index: {}]   ;;  %s580_s2 = inlined_call_operand.vmem [shape: bf16[128,64], index: 2, kind: input, shape index: {}]   ;;  %s581_s3 = inlined_call_operand.vmem [shape: bf16[12,64], index: 3, kind: input, shape index: {}]   ;;  %s582_s4 = inlined_call_operand.vmem [shape: f32[1,64], index: 4, kind: input, shape index: {}]   ;;  %s583_s5 = inlined_call_operand.vmem [shape: bf16[64,64], index: 5, kind: input, shape index: {}]   ;;  %s584_s6 = inlined_call_operand.vmem [shape: f32[1,64], index: 6, kind: input, shape index: {}]   ;;  %s585_s7 = inlined_call_operand.vmem [shape: bf16[64,3], index: 7, kind: input, shape index: {}]   ;;  %s586_s8 = inlined_call_operand.vmem [shape: f32[1,3], index: 8, kind: input, shape index: {}]   ;;  %s587_s9 = inlined_call_operand.hbm [shape: f32[3,8], index: 9, kind: output, shape index: {}]  }
   0x1   :  { %v410_v0 = vld [vmem:[%s580_s2 + $0x38] sm:$0xff]  ;;  %v334_v1 = vld [vmem:[%s581_s3] sm:$0xf]  ;;  %v409_v2 = vld [vmem:[%s580_s2 + $0x30] sm:$0xff] }
   0x2   :  { %130 = vmatpush.bf16.msra.mxu1 %v410_v0  ;;  %v411_v3 = vld [vmem:[%s581_s3] sm:$0x30] }
   0x3   :  { %v36_v4 = vld [vmem:[%s579_s1] sm:$0xff]  ;;  %v335_v5 = vor.u32 %v411_v3, %v334_v1 }
   0x4   :  { %v37_v7 = vpack.c.bf16 %v36_v4, %v36_v4 }
   0x5   :  { %v67_v6 = vsel %vm65_vm0, %v335_v5, 0 }
   0x6   :  { %14 = vsyncpa [#allocation3], 0  ;;  %131 = vmatpush.bf16.msra.mxu1 %v409_v2  ;;  %v408_v8 = vld [vmem:[%s580_s2 + $0x28] sm:$0xff]  ;;  %76 = vmatpush.bf16.msra.mxu0 %v67_v6  ;;  %vm61_vm1 = vcmask 97280   ;;  %v407_v9 = vld [vmem:[%s580_s2 + $0x20] sm:$0xff]  ;;  %vm186_vm2 = vcmask 523264  }
   0x7   :  { %v406_v10 = vld [vmem:[%s580_s2 + $0x18] sm:$0xff]  ;;  %v405_v11 = vld [vmem:[%s580_s2 + $0x10] sm:$0xff]  ;;  %v404_v12 = vld [vmem:[%s580_s2 + $0x8] sm:$0xff]  ;;  %vm257_vm3 = vcmask 23552   ;;  %s323_s27 = sshll.u32 %s587_s9, 4  ;;  %vm314_vm8 = vcmask 59392   ;;  %s324_s27 = int_to_ptr.hbm [resolvable:$true] %s323_s27 }
   0x8   :  { %v403_v13 = vld [vmem:[%s580_s2] sm:$0xff]  ;;  %v415_v16 = vld [vmem:[%s583_s5 + $0x18] sm:$0xff]  ;;  %v414_v17 = vld [vmem:[%s583_s5 + $0x10] sm:$0xff] }
   0x9   :  { %336 = vmatmul.msk.bf16.vlgmr.msra.gmra.mxu0 %vm61_vm1, %v37_v7  ;;  %v34_v14 = vld [vmem:[%s578_s0] sm:$0xff]  ;;  %194 = vmatpush.bf16.msra.mxu2 %v415_v16  ;;  %v413_v18 = vld [vmem:[%s583_s5 + $0x8] sm:$0xff]  ;;  %v419_v21 = vld [vmem:[%s585_s7 + $0x18] sm:$0xff] }
   0xa   :  { %132 = vmatpush.bf16.msra.mxu1 %v408_v8  ;;  %v35_v15 = vpack.c.bf16 %v34_v14, %v34_v14  ;;  %v412_v19 = vld [vmem:[%s583_s5] sm:$0xff]  ;;  %248 = vmatpush.bf16.msra.mxu3 %v419_v21  ;;  %v418_v22 = vld [vmem:[%s585_s7 + $0x10] sm:$0xff]  ;;  %v417_v31 = vld [vmem:[%s585_s7 + $0x8] sm:$0xff] }
   0xb   :  { %v422_v24 = vld [vmem:[%s582_s4] ss:$0 sm:$0xff] }
   0xc   :  { %v416_v32 = vld [vmem:[%s585_s7] sm:$0xff] }
   0xd   :  { %195 = vmatpush.bf16.msra.mxu2 %v414_v17  ;;  %v423_v33 = vld [vmem:[%s584_s6] ss:$0 sm:$0xff]  ;;  %s455_s6 = smov [#allocation2]  }
   0xe   :  { %133 = vmatpush.bf16.msra.mxu1 %v407_v9  ;;  %249 = vmatpush.bf16.msra.mxu3 %v418_v22  ;;  %v424_v39 = vld [vmem:[%s586_s8] ss:$0 sm:$0xff]  ;;  %s321_s7 = sshll.u32 %s455_s6, 4  ;;  %s322_s7 = int_to_ptr.vmem [resolvable:$true] %s321_s7 }
  0x11   :  { %196 = vmatpush.bf16.msra.mxu2 %v413_v18 }
  0x12   :  { %134 = vmatpush.bf16.msra.mxu1 %v406_v10  ;;  %250 = vmatpush.bf16.msra.mxu3 %v417_v31 }
  0x15   :  { %197 = vmatpush.bf16.msra.mxu2 %v412_v19 }
  0x16   :  { %135 = vmatpush.bf16.msra.mxu1 %v405_v11  ;;  %251 = vmatpush.bf16.msra.mxu3 %v416_v32 }
  0x1a   :  { %136 = vmatpush.bf16.msra.mxu1 %v404_v12 }
  0x1e   :  { %137 = vmatpush.bf16.msra.mxu1 %v403_v13 }
  0x21   :  { %138 = vmatmul.bf16.vlgmr.msra.gmra.mxu1 %v35_v15 }
  0x86   :  { %v78_v20 = vpop.f32.mrf.mxu0 }
  0x8e   :  { %v80_v23 = vpop.f32.mrf.mxu0 }
  0x9e   :  { %v139_v25 = vpop.f32.mrf.mxu1 }
  0x9f   :  { %v140_v26 = vadd.f32 %v139_v25, %v78_v20 }
  0xa1   :  { %v147_v27 = vadd.f32 %v422_v24, %v140_v26 }
  0xa3   :  { %v148_v28 = vmax.f32 %v147_v27, 0.0 }
  0xa5   :  { %v149_v29 = vpack.c.bf16 %v148_v28, %v148_v28 }
  0xa6   :  { %v141_v30 = vpop.f32.mrf.mxu1 }
  0xa7   :  { %385 = vmatmul.msk.bf16.vlgmr.msra.gmra.mxu2 %vm186_vm2, %v149_v29 }
 0x12a   :  { %v199_v34 = vpop.f32.mrf.mxu2 }
 0x12b   :  { %v200_v35 = vadd.f32 %v423_v33, %v199_v34 }
 0x12d   :  { %v203_v36 = vmax.f32 %v200_v35, 0.0 }
 0x12f   :  { %v204_v37 = vpack.c.bf16 %v203_v36, %v203_v36 }
 0x131   :  { %402 = vmatmul.msk.bf16.vlgmr.msra.gmra.mxu3 %vm186_vm2, %v204_v37 }
 0x132   :  { %v201_v38 = vpop.f32.mrf.mxu2 }
 0x1b4   :  { %v253_v40 = vpop.f32.mrf.mxu3 }
 0x1b5   :  { %v254_v41 = vadd.f32 %v424_v39, %v253_v40 }
 0x1b7   :  { %v258_v42 = vsel %vm257_vm3, %v254_v41, -inf }
 0x1b8   :  { %259 = vmax.xlane.f32.xlu0 %v258_v42 }
 0x1bc   :  { %v255_v43 = vpop.f32.mrf.mxu3 }
 0x22b   :  { %v260_v44 = vpop.xlane.xlu0 %259 }
 0x22c   :  { %v261_v45 = vsub.f32 %v254_v41, %v260_v44 }
 0x22e   :  { %v262_v46 = vmul.f32 1.442695, %v261_v45 }
 0x230   :  { %425 = vpow2.f32 %v262_v46 }
 0x236   :  { %v426_v47 = vpop.eup %425 }
 0x237   :  { %v264_v48 = vsel %vm257_vm3, %v426_v47, 0.0 }
 0x238   :  { %265 = vadd.xlane.f32.xlu0 %v264_v48 }
 0x2ab   :  { %v266_v49 = vpop.xlane.xlu0 %265 }
 0x2ac   :  { %427 = vrcp.f32 %v266_v49  ;;  %v278_v53 = vand.u32 2147483648, %v266_v49  ;;  %v276_v55 = vand.u32 2147483647, %v266_v49  ;;  %vm272_vm5 = vweird.f32 %v266_v49 }
 0x2ae   :  { %v279_v57 = vor.u32 1.1754944e-38, %v278_v53  ;;  %vm277_vm7 = vcmp.eq.f32.partialorder %v276_v55, 8.507059e+37 }
 0x2b2   :  { %v428_v50 = vpop.eup %427 }
 0x2b3   :  { %v268_v51 = vmul.f32 %v428_v50, %v266_v49  ;;  %vm273_vm4 = vweird.f32 %v428_v50 }
 0x2b4   :  { %vm274_vm6 = vmor %vm272_vm5, %vm273_vm4 }
 0x2b5   :  { %v269_v52 = vsub.f32 1.0, %v268_v51 }
 0x2b7   :  { %v270_v54 = vmul.f32 %v428_v50, %v269_v52 }
 0x2b9   :  { %v271_v56 = vadd.f32 %v428_v50, %v270_v54 }
 0x2bb   :  { %v275_v58 = vsel %vm274_vm6, %v428_v50, %v271_v56 }
 0x2bc   :  { %v280_v59 = vsel %vm277_vm7, %v279_v57, %v275_v58 }
 0x2bd   :  { %v281_v60 = vmul.f32 %v426_v47, %v280_v59 }
 0x2bf   :  { %282 = vxpose.xlu1.b32.start.end [1/1] (short) (narrow) %v281_v60, 8 }
 0x363   :  { %v298_v61 = vpop.trf.xlu1 }
 0x364   :  { %315 = vst.msk [vmem:[#allocation2] sm:$0x7] %vm314_vm8, %v298_v61 }
 0x365   :  { %326 = dma.vmem_to_hbm [thread:$0]  %s322_s7, 64, %s324_s27, [#allocation3]  }
 0x366   :  { %453 = dma.done.wait [#allocation3], 64  }
 0x367   :  { %454 = vsyncadd [#allocation3], 4294967232 }
 0x368   :  { %331 = vsyncpa [#allocation3], 1 }

</bundles_post_ra>
